<compile_context>
chip_gen: v7x
topology: tpu7x:2x2x1
jax: 0.10.0
libtpu: 0.0.40
codegen_flags: <defaults>
</compile_context>

<pallas_src>
import functools

import jax
import jax.numpy as jnp
from jax.experimental import pallas as pl
from jax.experimental.pallas import tpu as pltpu

LANE = 128
N_LAYERS = 6  # gene, pathway, layer1, layer2, layer3, output


def _round_up(n, m):
    return ((n + m - 1) // m) * m


def _pad2d(a, rows, cols):
    r, c = a.shape
    return jnp.pad(a, ((0, rows - r), (0, cols - c)))


# ---------------------------------------------------------------------------
# Kernel: fully fused 6-matmul MLP chain (5 ReLUs), f32, weights resident.
# ---------------------------------------------------------------------------
def cds_kernel(x_ref, w_ref, b_ref, out_ref):
    # w_ref: (6, P, P) packed weights (masks already folded in at prepare time)
    # b_ref: (8, P)    packed biases (rows 6..7 are zero padding)
    b = b_ref[...]            # load all biases once (tiny, resident)
    h = x_ref[...]            # (tb, P) batch tile

    # Hidden layers: matmul + bias + ReLU.  Static Python loop unrolls at trace
    # time; w_ref[k] with a static k is a single (P, P) load.
    for k in range(N_LAYERS - 1):
        h = jnp.dot(h, w_ref[k], preferred_element_type=jnp.float32) + b[k]
        h = jnp.maximum(h, 0.0)

    # Output head (no ReLU).  Lane-dense (tb, P) store; only column 0 is real.
    out_ref[...] = (jnp.dot(h, w_ref[N_LAYERS - 1],
                            preferred_element_type=jnp.float32)
                    + b[N_LAYERS - 1])


# ---------------------------------------------------------------------------
# One-time parameter preparation (mask fold-in, padding, packing).
# ---------------------------------------------------------------------------
def prepare_params(params):
    """Apply the binary masks once (MaskedLinear.forward semantics), pad every
    feature dim to a common lane-padded width P, and pack weights/biases into
    two arrays.  Run this ONCE per parameter set; it is not on the call path."""
    wg = params["wg"] * params["xg_mask"]
    wp = params["wp"] * params["gp_mask"]
    ws = [wg, wp, params["w1"], params["w2"], params["w3"], params["wo"]]
    bs = [params["bg"], params["bp"], params["b1"], params["b2"],
          params["b3"], params["bo"]]

    # True layer widths: [n_in, n_gene, n_pathway, n_h1, n_h2, n_h3, 1]
    dims = (ws[0].shape[0],) + tuple(w.shape[1] for w in ws)
    P = max(LANE, _round_up(max(dims[:-1]), LANE))  # common padded width

    w_packed = jnp.stack(
        [_pad2d(w.astype(jnp.float32), P, P) for w in ws])            # (6, P, P)
    b_rows = [_pad2d(b.astype(jnp.float32).reshape(1, -1), 1, P) for b in bs]
    b_packed = jnp.concatenate(
        b_rows + [jnp.zeros((8 - N_LAYERS, P), jnp.float32)], axis=0)  # (8, P)

    packed = dict(w=w_packed, b=b_packed)
    meta = dict(P=P, dims=dims)
    return packed, meta


# ---------------------------------------------------------------------------
# Jitted forward.  Everything left on the call path (x pad, pallas_call,
# output slice) fuses under jit.
# ---------------------------------------------------------------------------
@functools.partial(jax.jit, static_argnames=("P", "dims"))
def _cds_forward_impl(x, w_packed, b_packed, *, P, dims):
    B, n_in = x.shape

    # Grid sizing: 2 parallel batch tiles when there's enough batch to shard
    # across the two v7x TensorCores; otherwise a single grid step (strictly
    # faster on single-TC v5e / v6e).
    n_tiles = 2 if B >= 256 else 1
    tb = _round_up(pl.cdiv(B, n_tiles), 8)   # sublane-aligned batch tile
    Bp = tb * n_tiles

    x_p = jnp.pad(x.astype(jnp.float32), ((0, Bp - B), (0, P - n_in)))

    # Advisory cost estimate with TRUE (unpadded) sizes.
    flops = 2 * B * sum(dims[i] * dims[i + 1] for i in range(N_LAYERS))
    bytes_accessed = 4 * (B * n_in
                          + sum(dims[i] * dims[i + 1] + dims[i + 1]
                                for i in range(N_LAYERS))
                          + B * dims[-1])

    out_padded = pl.pallas_call(
        cds_kernel,
        out_shape=jax.ShapeDtypeStruct((Bp, P), jnp.float32),
        grid_spec=pltpu.PrefetchScalarGridSpec(
            num_scalar_prefetch=0,
            grid=(n_tiles,),
            in_specs=[
                pl.BlockSpec((tb, P), lambda i: (i, 0)),            # x: batch-tiled
                pl.BlockSpec((N_LAYERS, P, P), lambda i: (0, 0, 0)),  # packed weights, resident
                pl.BlockSpec((8, P), lambda i: (0, 0)),             # packed biases, resident
            ],
            out_specs=pl.BlockSpec((tb, P), lambda i: (i, 0)),
        ),
        compiler_params=pltpu.CompilerParams(
            dimension_semantics=("parallel",),   # batch tiles are independent
            vmem_limit_bytes=32 * 1024 * 1024,   # resident set + buffers ~1 MiB
        ),
        cost_estimate=pl.CostEstimate(
            flops=flops, transcendentals=0, bytes_accessed=bytes_accessed),
    )(x_p, w_packed, b_packed)

    # Strip batch padding and the lane padding on the 1-wide head.
    return out_padded[:B, :1]


def cds_forward(x, packed, meta):
    return _cds_forward_impl(x, packed["w"], packed["b"],
                             P=meta["P"], dims=meta["dims"])


# ---------------------------------------------------------------------------
# Synthetic parameters + pure-JAX reference.
# ---------------------------------------------------------------------------
def make_params(key, n_in, n_gene, n_pathway, n_h1, n_h2, n_h3):
    """Deterministic synthetic parameters (PyTorch-like uniform init), stored [in,out]."""
    ks = jax.random.split(key, 16)

    def lin(kw, kb, fan_in, fan_out):
        bound = 1.0 / jnp.sqrt(jnp.float32(fan_in))
        w = jax.random.uniform(kw, (fan_in, fan_out), jnp.float32, -bound, bound)
        b = jax.random.uniform(kb, (1, fan_out), jnp.float32, -bound, bound)
        return w, b

    # binary masks (sparsity pattern), [in, out]
    xg_mask = (jax.random.uniform(ks[0], (n_in, n_gene)) < 0.5).astype(jnp.float32)
    gp_mask = (jax.random.uniform(ks[1], (n_gene, n_pathway)) < 0.5).astype(jnp.float32)

    wg, bg = lin(ks[2], ks[3], n_in, n_gene)
    wp, bp = lin(ks[4], ks[5], n_gene, n_pathway)
    w1, b1 = lin(ks[6], ks[7], n_pathway, n_h1)
    w2, b2 = lin(ks[8], ks[9], n_h1, n_h2)
    w3, b3 = lin(ks[10], ks[11], n_h2, n_h3)
    wo, bo = lin(ks[12], ks[13], n_h3, 1)

    # __init__ pre-masks the gene/pathway weights; forward() re-applies the
    # mask (folded once in prepare_params).
    wg = xg_mask * wg
    wp = gp_mask * wp

    return dict(xg_mask=xg_mask, wg=wg, bg=bg,
                gp_mask=gp_mask, wp=wp, bp=bp,
                w1=w1, b1=b1, w2=w2, b2=b2, w3=w3, b3=b3,
                wo=wo, bo=bo)


def cds_reference(x, p):
    """Pure-JAX reference matching the PyTorch forward semantics."""
    h = jax.nn.relu(x @ (p["wg"] * p["xg_mask"]) + p["bg"])
    h = jax.nn.relu(h @ (p["wp"] * p["gp_mask"]) + p["bp"])
    h = jax.nn.relu(h @ p["w1"] + p["b1"])
    h = jax.nn.relu(h @ p["w2"] + p["b2"])
    h = jax.nn.relu(h @ p["w3"] + p["b3"])
    return h @ p["wo"] + p["bo"]


if __name__ == "__main__":
    # Small shapes consistent with the module's forward; B=256 so the grid has
    # exactly 2 parallel batch tiles (one per v7x TensorCore).
    B, n_in, n_gene, n_pathway = 256, 16, 32, 16
    n_h1, n_h2, n_h3 = 32, 16, 8

    key = jax.random.PRNGKey(0)
    kx, kp = jax.random.split(key)
    x = jax.random.normal(kx, (B, n_in), jnp.float32)
    params = make_params(kp, n_in, n_gene, n_pathway, n_h1, n_h2, n_h3)

    # One-time prep (mask fold-in + pad + pack), off the call path.
    packed, meta = prepare_params(params)
    packed = jax.tree_util.tree_map(jax.block_until_ready, packed)

    out = cds_forward(x, packed, meta)
    out = jax.block_until_ready(out)

    ref = cds_reference(x, params)
    assert out.shape == (B, 1)
    assert jnp.allclose(out, ref, atol=1e-4, rtol=1e-4), "Pallas kernel mismatch vs JAX reference"

    print("KERNEL_OK")
</pallas_src>

<mosaic_0001>
module attributes {stable_mosaic.version = 11 : i64} {
  func.func @cds_kernel(%arg0: i32, %arg1: memref<128x128xf32, #tpu.memory_space<vmem>>, %arg2: memref<6x128x128xf32, #tpu.memory_space<vmem>>, %arg3: memref<8x128xf32, #tpu.memory_space<vmem>>, %arg4: memref<128x128xf32, #tpu.memory_space<vmem>>) attributes {dimension_semantics = [#tpu.dimension_semantics<parallel>], iteration_bounds = array<i64: 2>, scalar_prefetch = 0 : i64, scratch_operands = 0 : i64, tpu.core_type = #tpu.core_type<tc>, window_params = [{transform_indices = @transform_0, window_bounds = array<i64: 128, 128>}, {pipeline_mode = #tpu.pipeline_mode<synchronous>, transform_indices = @transform_1, window_bounds = array<i64: 6, 128, 128>}, {pipeline_mode = #tpu.pipeline_mode<synchronous>, transform_indices = @transform_2, window_bounds = array<i64: 8, 128>}, {transform_indices = @transform_3, window_bounds = array<i64: 128, 128>}]} {
    %c0 = arith.constant 0 : index
    %c0_0 = arith.constant 0 : index
    %0 = vector.load %arg3[%c0, %c0_0] : memref<8x128xf32, #tpu.memory_space<vmem>>, vector<8x128xf32>
    %c0_1 = arith.constant 0 : index
    %c0_2 = arith.constant 0 : index
    %1 = vector.load %arg1[%c0_1, %c0_2] : memref<128x128xf32, #tpu.memory_space<vmem>>, vector<128x128xf32>
    %c0_3 = arith.constant 0 : index
    %c0_4 = arith.constant 0 : index
    %c0_5 = arith.constant 0 : index
    %2 = vector.load %arg2[%c0_3, %c0_4, %c0_5] : memref<6x128x128xf32, #tpu.memory_space<vmem>>, vector<1x128x128xf32>
    %3 = vector.shape_cast %2 : vector<1x128x128xf32> to vector<128x128xf32>
    %cst = arith.constant dense<0.000000e+00> : vector<128x128xf32>
    %4 = tpu.matmul %1, %3, %cst {dimension_numbers = #tpu.dot_dimension_numbers<[1], [0], [0], [1], [0, 0, 1, 1], [], []>} : vector<128x128xf32>, vector<128x128xf32>, vector<128x128xf32> -> vector<128x128xf32>
    %5 = vector.extract_strided_slice %0 {offsets = [0, 0], sizes = [1, 128], strides = [1, 1]} : vector<8x128xf32> to vector<1x128xf32>
    %6 = vector.shape_cast %5 : vector<1x128xf32> to vector<128xf32>
    %7 = vector.shape_cast %6 : vector<128xf32> to vector<1x128xf32>
    %8 = vector.broadcast %7 : vector<1x128xf32> to vector<128x128xf32>
    %9 = arith.addf %4, %8 : vector<128x128xf32>
    %cst_6 = arith.constant 0.000000e+00 : f32
    %10 = vector.broadcast %cst_6 : f32 to vector<128x128xf32>
    %11 = arith.maximumf %9, %10 : vector<128x128xf32>
    %c1 = arith.constant 1 : index
    %c0_7 = arith.constant 0 : index
    %c0_8 = arith.constant 0 : index
    %12 = vector.load %arg2[%c1, %c0_7, %c0_8] : memref<6x128x128xf32, #tpu.memory_space<vmem>>, vector<1x128x128xf32>
    %13 = vector.shape_cast %12 : vector<1x128x128xf32> to vector<128x128xf32>
    %cst_9 = arith.constant dense<0.000000e+00> : vector<128x128xf32>
    %14 = tpu.matmul %11, %13, %cst_9 {dimension_numbers = #tpu.dot_dimension_numbers<[1], [0], [0], [1], [0, 0, 1, 1], [], []>} : vector<128x128xf32>, vector<128x128xf32>, vector<128x128xf32> -> vector<128x128xf32>
    %15 = vector.extract_strided_slice %0 {offsets = [1, 0], sizes = [1, 128], strides = [1, 1]} : vector<8x128xf32> to vector<1x128xf32>
    %16 = vector.shape_cast %15 : vector<1x128xf32> to vector<128xf32>
    %17 = vector.shape_cast %16 : vector<128xf32> to vector<1x128xf32>
    %18 = vector.broadcast %17 : vector<1x128xf32> to vector<128x128xf32>
    %19 = arith.addf %14, %18 : vector<128x128xf32>
    %cst_10 = arith.constant 0.000000e+00 : f32
    %20 = vector.broadcast %cst_10 : f32 to vector<128x128xf32>
    %21 = arith.maximumf %19, %20 : vector<128x128xf32>
    %c2 = arith.constant 2 : index
    %c0_11 = arith.constant 0 : index
    %c0_12 = arith.constant 0 : index
    %22 = vector.load %arg2[%c2, %c0_11, %c0_12] : memref<6x128x128xf32, #tpu.memory_space<vmem>>, vector<1x128x128xf32>
    %23 = vector.shape_cast %22 : vector<1x128x128xf32> to vector<128x128xf32>
    %cst_13 = arith.constant dense<0.000000e+00> : vector<128x128xf32>
    %24 = tpu.matmul %21, %23, %cst_13 {dimension_numbers = #tpu.dot_dimension_numbers<[1], [0], [0], [1], [0, 0, 1, 1], [], []>} : vector<128x128xf32>, vector<128x128xf32>, vector<128x128xf32> -> vector<128x128xf32>
    %25 = vector.extract_strided_slice %0 {offsets = [2, 0], sizes = [1, 128], strides = [1, 1]} : vector<8x128xf32> to vector<1x128xf32>
    %26 = vector.shape_cast %25 : vector<1x128xf32> to vector<128xf32>
    %27 = vector.shape_cast %26 : vector<128xf32> to vector<1x128xf32>
    %28 = vector.broadcast %27 : vector<1x128xf32> to vector<128x128xf32>
    %29 = arith.addf %24, %28 : vector<128x128xf32>
    %cst_14 = arith.constant 0.000000e+00 : f32
    %30 = vector.broadcast %cst_14 : f32 to vector<128x128xf32>
    %31 = arith.maximumf %29, %30 : vector<128x128xf32>
    %c3 = arith.constant 3 : index
    %c0_15 = arith.constant 0 : index
    %c0_16 = arith.constant 0 : index
    %32 = vector.load %arg2[%c3, %c0_15, %c0_16] : memref<6x128x128xf32, #tpu.memory_space<vmem>>, vector<1x128x128xf32>
    %33 = vector.shape_cast %32 : vector<1x128x128xf32> to vector<128x128xf32>
    %cst_17 = arith.constant dense<0.000000e+00> : vector<128x128xf32>
    %34 = tpu.matmul %31, %33, %cst_17 {dimension_numbers = #tpu.dot_dimension_numbers<[1], [0], [0], [1], [0, 0, 1, 1], [], []>} : vector<128x128xf32>, vector<128x128xf32>, vector<128x128xf32> -> vector<128x128xf32>
    %35 = vector.extract_strided_slice %0 {offsets = [3, 0], sizes = [1, 128], strides = [1, 1]} : vector<8x128xf32> to vector<1x128xf32>
    %36 = vector.shape_cast %35 : vector<1x128xf32> to vector<128xf32>
    %37 = vector.shape_cast %36 : vector<128xf32> to vector<1x128xf32>
    %38 = vector.broadcast %37 : vector<1x128xf32> to vector<128x128xf32>
    %39 = arith.addf %34, %38 : vector<128x128xf32>
    %cst_18 = arith.constant 0.000000e+00 : f32
    %40 = vector.broadcast %cst_18 : f32 to vector<128x128xf32>
    %41 = arith.maximumf %39, %40 : vector<128x128xf32>
    %c4 = arith.constant 4 : index
    %c0_19 = arith.constant 0 : index
    %c0_20 = arith.constant 0 : index
    %42 = vector.load %arg2[%c4, %c0_19, %c0_20] : memref<6x128x128xf32, #tpu.memory_space<vmem>>, vector<1x128x128xf32>
    %43 = vector.shape_cast %42 : vector<1x128x128xf32> to vector<128x128xf32>
    %cst_21 = arith.constant dense<0.000000e+00> : vector<128x128xf32>
    %44 = tpu.matmul %41, %43, %cst_21 {dimension_numbers = #tpu.dot_dimension_numbers<[1], [0], [0], [1], [0, 0, 1, 1], [], []>} : vector<128x128xf32>, vector<128x128xf32>, vector<128x128xf32> -> vector<128x128xf32>
    %45 = vector.extract_strided_slice %0 {offsets = [4, 0], sizes = [1, 128], strides = [1, 1]} : vector<8x128xf32> to vector<1x128xf32>
    %46 = vector.shape_cast %45 : vector<1x128xf32> to vector<128xf32>
    %47 = vector.shape_cast %46 : vector<128xf32> to vector<1x128xf32>
    %48 = vector.broadcast %47 : vector<1x128xf32> to vector<128x128xf32>
    %49 = arith.addf %44, %48 : vector<128x128xf32>
    %cst_22 = arith.constant 0.000000e+00 : f32
    %50 = vector.broadcast %cst_22 : f32 to vector<128x128xf32>
    %51 = arith.maximumf %49, %50 : vector<128x128xf32>
    %c5 = arith.constant 5 : index
    %c0_23 = arith.constant 0 : index
    %c0_24 = arith.constant 0 : index
    %52 = vector.load %arg2[%c5, %c0_23, %c0_24] : memref<6x128x128xf32, #tpu.memory_space<vmem>>, vector<1x128x128xf32>
    %53 = vector.shape_cast %52 : vector<1x128x128xf32> to vector<128x128xf32>
    %cst_25 = arith.constant dense<0.000000e+00> : vector<128x128xf32>
    %54 = tpu.matmul %51, %53, %cst_25 {dimension_numbers = #tpu.dot_dimension_numbers<[1], [0], [0], [1], [0, 0, 1, 1], [], []>} : vector<128x128xf32>, vector<128x128xf32>, vector<128x128xf32> -> vector<128x128xf32>
    %55 = vector.extract_strided_slice %0 {offsets = [5, 0], sizes = [1, 128], strides = [1, 1]} : vector<8x128xf32> to vector<1x128xf32>
    %56 = vector.shape_cast %55 : vector<1x128xf32> to vector<128xf32>
    %57 = vector.shape_cast %56 : vector<128xf32> to vector<1x128xf32>
    %58 = vector.broadcast %57 : vector<1x128xf32> to vector<128x128xf32>
    %59 = arith.addf %54, %58 : vector<128x128xf32>
    %c0_26 = arith.constant 0 : index
    %c0_27 = arith.constant 0 : index
    %60 = vector.load %arg4[%c0_26, %c0_27] : memref<128x128xf32, #tpu.memory_space<vmem>>, vector<128x128xf32>
    tpu.vector_store %arg4[%c0_26, %c0_27], %59 {strides = array<i32>} : memref<128x128xf32, #tpu.memory_space<vmem>>, vector<128x128xf32>,
    return
  }
  func.func @transform_0(%arg0: i32) -> (i32, i32) {
    %c0_i32 = arith.constant 0 : i32
    %c0_i32_0 = arith.constant 0 : i32
    return %arg0, %c0_i32 : i32, i32
  }
  func.func @transform_1(%arg0: i32) -> (i32, i32, i32) {
    %c0_i32 = arith.constant 0 : i32
    %c0_i32_0 = arith.constant 0 : i32
    %c0_i32_1 = arith.constant 0 : i32
    %c0_i32_2 = arith.constant 0 : i32
    return %c0_i32, %c0_i32_0, %c0_i32_1 : i32, i32, i32
  }
  func.func @transform_2(%arg0: i32) -> (i32, i32) {
    %c0_i32 = arith.constant 0 : i32
    %c0_i32_0 = arith.constant 0 : i32
    %c0_i32_1 = arith.constant 0 : i32
    return %c0_i32, %c0_i32_0 : i32, i32
  }
  func.func @transform_3(%arg0: i32) -> (i32, i32) {
    %c0_i32 = arith.constant 0 : i32
    %c0_i32_0 = arith.constant 0 : i32
    return %arg0, %c0_i32 : i32, i32
  }
}

</mosaic_0001>

<bundles_post_ra>
// kernel: _cds_forward_impl.1
= control target key start
LH: loop header
LB: loop body
LE: loop exit
PB: predicated region body
PF: predicated region fallthrough
CT: control target
= control target key end

     0   :  { %s2185_s12 = smov 0   ;;  %s2552_s0 = inlined_call_operand.vmem [shape: f32[256,128], index: 0, kind: input, shape index: {}]   ;;  %s2553_s1 = inlined_call_operand.vmem [shape: f32[6,128,128], index: 1, kind: input, shape index: {}]   ;;  %s2554_s2 = inlined_call_operand.vmem [shape: f32[8,128], index: 2, kind: input, shape index: {}]   ;;  %s2555_s3 = inlined_call_operand.vmem [shape: f32[256,128], index: 3, kind: output, shape index: {}]  }
   0x1 LB: > { %s1338_s13 = sadd.s32 4294967295, %s2163_s12   ;;  %p1342_p0 = scmp.ge.s32.totalorder %s2163_s12, 1  ;;  %s2163_s12 = sphi %s2185_s12, %s13_s12  }
   0x2   : > { %p138_p1 = scmp.lt.s32.totalorder %s2163_s12, 3 }
   0x4   : > { %p139_p2 = pnand %p1342_p0, %p138_p1 }
   0x5   : > { %v191_v0 = vld [vmem:[%s2553_s1] sm:$0xff] (!%p139_p2)  ;;  %v192_v1 = vld [vmem:[%s2553_s1 + $0x8] sm:$0xff] (!%p139_p2)  ;;  %v193_v2 = vld [vmem:[%s2553_s1 + $0x10] sm:$0xff] (!%p139_p2)  ;;  %s1343_s20 = sshll.u32 (!%p139_p2), %s1338_s13, 4 }
   0x6   : > { %142 = sbr.rel (%p139_p2) target bundleno = 1374 (0x55e), region = 32  ;;  %v1957_v3 = vpack.c.bf16 (!%p139_p2), %v192_v1, %v191_v0  ;;  %v194_v4 = vld [vmem:[%s2553_s1 + $0x18] sm:$0xff] (!%p139_p2)  ;;  %p163_p3 = scmp.lt.s32.totalorder (!%p139_p2), %s1343_s20, 31  ;;  %v195_v6 = vld [vmem:[%s2553_s1 + $0x20] sm:$0xff] (!%p139_p2)  ;;  %v196_v7 = vld [vmem:[%s2553_s1 + $0x28] sm:$0xff] (!%p139_p2) }
   0x7   : > { %v1961_v5 = vpack.c.bf16 (!%p139_p2), %v194_v4, %v193_v2  ;;  %v1965_v8 = vpack.c.bf16 (!%p139_p2), %v196_v7, %v195_v6  ;;  %v197_v9 = vld [vmem:[%s2553_s1 + $0x30] sm:$0xff] (!%p139_p2)  ;;  %v1347_v10 = vld [vmem:[%s2553_s1 + $0x80] sm:$0xff] (!%p139_p2)  ;;  %v1348_v11 = vld [vmem:[%s2553_s1 + $0x88] sm:$0xff] (!%p139_p2) }
   0x8   : > { %1958 = vmatprep.subr.bf16.mxu0 (!%p139_p2), %v1957_v3  ;;  %v198_v12 = vld [vmem:[%s2553_s1 + $0x38] sm:$0xff] (!%p139_p2)  ;;  %v1989_v13 = vpack.c.bf16 (!%p139_p2), %v1348_v11, %v1347_v10  ;;  %v1349_v14 = vld [vmem:[%s2553_s1 + $0x90] sm:$0xff] (!%p139_p2)  ;;  %v199_v19 = vld [vmem:[%s2553_s1 + $0x40] sm:$0xff] (!%p139_p2) }
   0x9   : > { %1960 = vmatpush3.bf16.msra.mxu0 (!%p139_p2), %v1957_v3  ;;  %v1350_v15 = vld [vmem:[%s2553_s1 + $0x98] sm:$0xff] (!%p139_p2)  ;;  %v1969_v18 = vpack.c.bf16 (!%p139_p2), %v198_v12, %v197_v9  ;;  %v200_v20 = vld [vmem:[%s2553_s1 + $0x48] sm:$0xff] (!%p139_p2)  ;;  %v1351_v21 = vld [vmem:[%s2553_s1 + $0xa0] sm:$0xff] (!%p139_p2) }
   0xa   : > { %1962 = vmatprep.subr.bf16.mxu0 (!%p139_p2), %v1961_v5  ;;  %v1993_v17 = vpack.c.bf16 (!%p139_p2), %v1350_v15, %v1349_v14  ;;  %1990 = vmatprep.subr.bf16.mxu1 (!%p139_p2), %v1989_v13  ;;  %v1352_v22 = vld [vmem:[%s2553_s1 + $0xa8] sm:$0xff] (!%p139_p2)  ;;  %v1353_v23 = vld [vmem:[%s2553_s1 + $0xb0] sm:$0xff] (!%p139_p2)  ;;  %v1973_v24 = vpack.c.bf16 (!%p139_p2), %v200_v20, %v199_v19  ;;  %v1354_v26 = vld [vmem:[%s2553_s1 + $0xb8] sm:$0xff] (!%p139_p2) }
   0xb   : > { %1992 = vmatpush3.bf16.msra.mxu1 (!%p139_p2), %v1989_v13  ;;  %v1997_v25 = vpack.c.bf16 (!%p139_p2), %v1352_v22, %v1351_v21  ;;  %v201_v27 = vld [vmem:[%s2553_s1 + $0x50] sm:$0xff] (!%p139_p2)  ;;  %v202_v28 = vld [vmem:[%s2553_s1 + $0x58] sm:$0xff] (!%p139_p2)  ;;  %v2001_v29 = vpack.c.bf16 (!%p139_p2), %v1354_v26, %v1353_v23  ;;  %v1355_v30 = vld [vmem:[%s2553_s1 + $0xc0] sm:$0xff] (!%p139_p2)  ;;  %v207_v21 = vlaneseq (!%p139_p2) }
   0xc   : > { %1994 = vmatprep.subr.bf16.mxu1 (!%p139_p2), %v1993_v17  ;;  %v1356_v31 = vld [vmem:[%s2553_s1 + $0xc8] sm:$0xff] (!%p139_p2)  ;;  %v1977_v32 = vpack.c.bf16 (!%p139_p2), %v202_v28, %v201_v27  ;;  %v203_v33 = vld [vmem:[%s2553_s1 + $0x60] sm:$0xff] (!%p139_p2)  ;;  %v1357_v36 = vld [vmem:[%s2553_s1 + $0xd0] sm:$0xff] (!%p139_p2) }
   0xd   : > { %s2557_s20 = smov (!%p163_p3, %s1343_s20), 31  ;;  %1964 = vmatpush3.bf16.msra.mxu0 %v1961_v5  ;;  %v204_v34 = vld [vmem:[%s2553_s1 + $0x68] sm:$0xff]  ;;  %v2005_v35 = vpack.c.bf16 %v1356_v31, %v1355_v30  ;;  %v1358_v37 = vld [vmem:[%s2553_s1 + $0xd8] sm:$0xff]  ;;  %v205_v39 = vld [vmem:[%s2553_s1 + $0x70] sm:$0xff]  ;;  %v2357_v22 = vshrl.u32 %v207_v21, 7 }
   0xe   : > { %s1344_s29 = sshll.u32 %s2557_s20, 3  ;;  %1966 = vmatprep.subr.bf16.mxu0 %v1965_v8  ;;  %v1981_v38 = vpack.c.bf16 %v204_v34, %v203_v33  ;;  %v206_v40 = vld [vmem:[%s2553_s1 + $0x78] sm:$0xff]  ;;  %v2009_v41 = vpack.c.bf16 %v1358_v37, %v1357_v36  ;;  %v1359_v42 = vld [vmem:[%s2553_s1 + $0xe0] sm:$0xff]  ;;  %v1360_v43 = vld [vmem:[%s2553_s1 + $0xe8] sm:$0xff] }
   0xf   : > { %s2231_s11 = scalar_lea.vmem %s2552_s0, %s1344_s29  ;;  %1996 = vmatpush3.bf16.msra.mxu1 %v1993_v17  ;;  %v1985_v44 = vpack.c.bf16 %v206_v40, %v205_v39  ;;  %v2013_v45 = vpack.c.bf16 %v1360_v43, %v1359_v42  ;;  %v1361_v61 = vld [vmem:[%s2553_s1 + $0xf0] sm:$0xff]  ;;  %v1362_v62 = vld [vmem:[%s2553_s1 + $0xf8] sm:$0xff]  ;;  %v1363_v0 = vld [vmem:[%s2553_s1 + $0x100] sm:$0xff]  ;;  %v209_v23 = vsub.s32 0, %v2357_v22  ;;  %s2531_s23 = scalar_lea.vmem %s2555_s3, %s1344_s29 }
  0x10   : > { %v175_v16 = vld [vmem:[%s2231_s11] sm:$0xff]  ;;  %1998 = vmatprep.subr.bf16.mxu1 %v1997_v25  ;;  %v176_v46 = vld [vmem:[%s2231_s11 + $0x8] sm:$0xff]  ;;  %v177_v47 = vld [vmem:[%s2231_s11 + $0x10] sm:$0xff]  ;;  %v2017_v63 = vpack.c.bf16 %v1362_v62, %v1361_v61 }
  0x11   : > { %1653 = vmatprep.mubr.f32.mxu0 %v175_v16  ;;  %1968 = vmatpush3.bf16.msra.mxu0 %v1965_v8  ;;  %v178_v48 = vld [vmem:[%s2231_s11 + $0x18] sm:$0xff]  ;;  %v179_v49 = vld [vmem:[%s2231_s11 + $0x20] sm:$0xff]  ;;  %v180_v50 = vld [vmem:[%s2231_s11 + $0x28] sm:$0xff] }
  0x12   : > { %1970 = vmatprep.subr.bf16.mxu0 %v1969_v18  ;;  %v181_v51 = vld [vmem:[%s2231_s11 + $0x30] sm:$0xff]  ;;  %v182_v52 = vld [vmem:[%s2231_s11 + $0x38] sm:$0xff]  ;;  %v183_v53 = vld [vmem:[%s2231_s11 + $0x40] sm:$0xff] }
  0x13   : > { %2000 = vmatpush3.bf16.msra.mxu1 %v1997_v25  ;;  %v184_v54 = vld [vmem:[%s2231_s11 + $0x48] sm:$0xff]  ;;  %v185_v55 = vld [vmem:[%s2231_s11 + $0x50] sm:$0xff]  ;;  %v186_v56 = vld [vmem:[%s2231_s11 + $0x58] sm:$0xff] }
  0x14   : > { %2002 = vmatprep.subr.bf16.mxu1 %v2001_v29  ;;  %v187_v57 = vld [vmem:[%s2231_s11 + $0x60] sm:$0xff]  ;;  %v188_v58 = vld [vmem:[%s2231_s11 + $0x68] sm:$0xff]  ;;  %v189_v59 = vld [vmem:[%s2231_s11 + $0x70] sm:$0xff] }
  0x15   : > { %1972 = vmatpush3.bf16.msra.mxu0 %v1969_v18  ;;  %v190_v60 = vld [vmem:[%s2231_s11 + $0x78] sm:$0xff]  ;;  %v1364_v1 = vld [vmem:[%s2553_s1 + $0x108] sm:$0xff]  ;;  %v1365_v2 = vld [vmem:[%s2553_s1 + $0x110] sm:$0xff] }
  0x16   : > { %1974 = vmatprep.subr.bf16.mxu0 %v1973_v24  ;;  %v2021_v3 = vpack.c.bf16 %v1364_v1, %v1363_v0  ;;  %v1366_v4 = vld [vmem:[%s2553_s1 + $0x118] sm:$0xff]  ;;  %v1367_v6 = vld [vmem:[%s2553_s1 + $0x120] sm:$0xff]  ;;  %v1368_v7 = vld [vmem:[%s2553_s1 + $0x128] sm:$0xff] }
  0x17   : > { %2004 = vmatpush3.bf16.msra.mxu1 %v2001_v29  ;;  %v2025_v5 = vpack.c.bf16 %v1366_v4, %v1365_v2  ;;  %v2029_v8 = vpack.c.bf16 %v1368_v7, %v1367_v6  ;;  %v1369_v9 = vld [vmem:[%s2553_s1 + $0x130] sm:$0xff]  ;;  %v1370_v10 = vld [vmem:[%s2553_s1 + $0x138] sm:$0xff]  ;;  %v1371_v12 = vld [vmem:[%s2553_s1 + $0x140] sm:$0xff] }
  0x18   : > { %2006 = vmatprep.subr.bf16.mxu1 %v2005_v35  ;;  %v2033_v11 = vpack.c.bf16 %v1370_v10, %v1369_v9  ;;  %v1372_v13 = vld [vmem:[%s2553_s1 + $0x148] sm:$0xff]  ;;  %v1373_v15 = vld [vmem:[%s2553_s1 + $0x150] sm:$0xff]  ;;  %v1374_v16 = vld [vmem:[%s2553_s1 + $0x158] sm:$0xff] }
  0x19   : > { %1976 = vmatpush3.bf16.msra.mxu0 %v1973_v24  ;;  %v2037_v14 = vpack.c.bf16 %v1372_v13, %v1371_v12  ;;  %v2041_v17 = vpack.c.bf16 %v1374_v16, %v1373_v15  ;;  %v1375_v18 = vld [vmem:[%s2553_s1 + $0x160] sm:$0xff]  ;;  %v1376_v19 = vld [vmem:[%s2553_s1 + $0x168] sm:$0xff]  ;;  %v1377_v10 = vld [vmem:[%s2553_s1 + $0x170] sm:$0xff] }
  0x1a   : > { %1978 = vmatprep.subr.bf16.mxu0 %v1977_v32  ;;  %v2045_v20 = vpack.c.bf16 %v1376_v19, %v1375_v18  ;;  %v2363_v24 = vld [vmem:[%s2554_s2] sm:$0xff]  ;;  %v1381_v15 = vld [vmem:[%s2553_s1 + $0x190] sm:$0xff] }
  0x1b   : > { %2008 = vmatpush3.bf16.msra.mxu1 %v2005_v35  ;;  %v210_v25 = vrot.slane %v2363_v24, %v209_v23  ;;  %v1379_v13 = vld [vmem:[%s2553_s1 + $0x180] sm:$0xff]  ;;  %v1385_v23 = vld [vmem:[%s2553_s1 + $0x1b0] sm:$0xff] }
  0x1c   : > { %2010 = vmatprep.subr.bf16.mxu1 %v2009_v41  ;;  %v1383_v19 = vld [vmem:[%s2553_s1 + $0x1a0] sm:$0xff] }
  0x1d   : > { %1980 = vmatpush3.bf16.msra.mxu0 %v1977_v32 }
  0x1e   : > { %1982 = vmatprep.subr.bf16.mxu0 %v1981_v38 }
  0x1f   : > { %2012 = vmatpush3.bf16.msra.mxu1 %v2009_v41 }
  0x20   : > { %2014 = vmatprep.subr.bf16.mxu1 %v2013_v45 }
  0x21   : > { %1984 = vmatpush3.bf16.msra.mxu0 %v1981_v38 }
  0x22   : > { %1986 = vmatprep.subr.bf16.mxu0 %v1985_v44 }
  0x23   : > { %2016 = vmatpush3.bf16.msra.mxu1 %v2013_v45 }
  0x24   : > { %2018 = vmatprep.subr.bf16.mxu1 %v2017_v63 }
  0x25   : > { %1988 = vmatpush3.bf16.msra.mxu0 %v1985_v44 }
  0x26   : > { %2022 = vmatprep.subr.bf16.mxu0 %v2021_v3 }
  0x27   : > { %2020 = vmatpush3.bf16.msra.mxu1 %v2017_v63 }
  0x28   : > { %1654 = vmatmul.mubr.f32.vlgmr.msra.gmra.mrb[0].mxu0 %v176_v46 }
  0x29   : > { %1656 = vmatprep.mubr.f32.mxu0 %v177_v47  ;;  %2024 = vmatpush3.bf16.msra.mxu0 %v2021_v3 }
  0x2a   : > { %2026 = vmatprep.subr.bf16.mxu0 %v2025_v5 }
  0x2c   : > { %1657 = vmatmul.mubr.f32.gmra.mrb[2].mxu0 %v178_v48 }
  0x2d   : > { %1659 = vmatprep.mubr.f32.mxu0 %v179_v49  ;;  %2028 = vmatpush3.bf16.msra.mxu0 %v2025_v5 }
  0x2e   : > { %2030 = vmatprep.subr.bf16.mxu0 %v2029_v8 }
  0x30   : > { %1660 = vmatmul.mubr.f32.gmra.mrb[4].mxu0 %v180_v50 }
  0x31   : > { %1662 = vmatprep.mubr.f32.mxu0 %v181_v51  ;;  %2032 = vmatpush3.bf16.msra.mxu0 %v2029_v8 }
  0x32   : > { %2034 = vmatprep.subr.bf16.mxu0 %v2033_v11 }
  0x34   : > { %1663 = vmatmul.mubr.f32.gmra.mrb[6].mxu0 %v182_v52 }
  0x35   : > { %1665 = vmatprep.mubr.f32.mxu0 %v183_v53  ;;  %2036 = vmatpush3.bf16.msra.mxu0 %v2033_v11  ;;  %v1378_v11 = vld [vmem:[%s2553_s1 + $0x178] sm:$0xff] }
  0x36   : > { %2038 = vmatprep.subr.bf16.mxu0 %v2037_v14  ;;  %v2049_v12 = vpack.c.bf16 %v1378_v11, %v1377_v10 }
  0x38   : > { %1666 = vmatmul.mubr.f32.gmra.mrb[8].mxu0 %v184_v54 }
  0x39   : > { %1668 = vmatprep.mubr.f32.mxu0 %v185_v55  ;;  %2040 = vmatpush3.bf16.msra.mxu0 %v2037_v14  ;;  %v1380_v14 = vld [vmem:[%s2553_s1 + $0x188] sm:$0xff] }
  0x3a   : > { %2042 = vmatprep.subr.bf16.mxu0 %v2041_v17  ;;  %v2053_v16 = vpack.c.bf16 %v1380_v14, %v1379_v13 }
  0x3c   : > { %1669 = vmatmul.mubr.f32.gmra.mrb[10].mxu0 %v186_v56  ;;  %2054 = vmatprep.subr.bf16.mxu1 %v2053_v16 }
  0x3d   : > { %1671 = vmatprep.mubr.f32.mxu0 %v187_v57  ;;  %2044 = vmatpush3.bf16.msra.mxu0 %v2041_v17  ;;  %v1382_v17 = vld [vmem:[%s2553_s1 + $0x198] sm:$0xff] }
  0x3e   : > { %2046 = vmatprep.subr.bf16.mxu0 %v2045_v20  ;;  %v2057_v18 = vpack.c.bf16 %v1382_v17, %v1381_v15 }
  0x40   : > { %1672 = vmatmul.mubr.f32.gmra.mrb[12].mxu0 %v188_v58 }
  0x41   : > { %1674 = vmatprep.mubr.f32.mxu0 %v189_v59  ;;  %2048 = vmatpush3.bf16.msra.mxu0 %v2045_v20  ;;  %v1384_v20 = vld [vmem:[%s2553_s1 + $0x1a8] sm:$0xff] }
  0x42   : > { %2050 = vmatprep.subr.bf16.mxu0 %v2049_v12  ;;  %v2061_v21 = vpack.c.bf16 %v1384_v20, %v1383_v19 }
  0x44   : > { %1675 = vmatmul.mubr.f32.gmra.mrb[14].mxu0 %v190_v60 }
  0x45   : > { %2052 = vmatpush3.bf16.msra.mxu0 %v2049_v12 }
  0xfb   : > { %v1655_v26 = vpop.f32.mrb[0].mxu0 }
  0xfc   : > { %v283_v27 = vadd.f32 %v1655_v26, %v210_v25  ;;  %v277_v28 = vpop.f32.mrb[1].mxu0 }
  0xfd   : > { %v278_v29 = vadd.f32 %v277_v28, %v210_v25  ;;  %v1388_v28 = vld [vmem:[%s2553_s1 + $0x1c8] sm:$0xff] }
  0xfe   : > { %v357_v32 = vmax.f32 %v283_v27, 0.0  ;;  %v1387_v27 = vld [vmem:[%s2553_s1 + $0x1c0] sm:$0xff] }
  0xff   : > { %v1658_v30 = vpop.f32.mrb[2].mxu0  ;;  %v356_v31 = vmax.f32 %v278_v29, 0.0  ;;  %v2069_v29 = vpack.c.bf16 %v1388_v28, %v1387_v27  ;;  %v1395_v27 = vld [vmem:[%s2553_s1 + $0x200] sm:$0xff]  ;;  %v1396_v28 = vld [vmem:[%s2553_s1 + $0x208] sm:$0xff] }
 0x100   : > { %v293_v33 = vadd.f32 %v1658_v30, %v210_v25  ;;  %v287_v34 = vpop.f32.mrb[3].mxu0  ;;  %v1389_v30 = vld [vmem:[%s2553_s1 + $0x1d0] sm:$0xff] }
 0x101   : > { %v288_v35 = vadd.f32 %v287_v34, %v210_v25  ;;  %1709 = vmatprep.mubr.f32.mxu1 %v356_v31  ;;  %v1390_v31 = vld [vmem:[%s2553_s1 + $0x1d8] sm:$0xff]  ;;  %v1392_v34 = vld [vmem:[%s2553_s1 + $0x1e8] sm:$0xff] }
 0x102   : > { %1710 = vmatmul.mubr.f32.vlgmr.msra.gmra.mrb[0].mxu1 %v357_v32  ;;  %v359_v38 = vmax.f32 %v293_v33, 0.0  ;;  %v2073_v32 = vpack.c.bf16 %v1390_v31, %v1389_v30  ;;  %v1391_v33 = vld [vmem:[%s2553_s1 + $0x1e0] sm:$0xff]  ;;  %v2085_v30 = vpack.c.bf16 %v1396_v28, %v1395_v27  ;;  %v1398_v31 = vld [vmem:[%s2553_s1 + $0x218] sm:$0xff] }
 0x103   : > { %v358_v36 = vmax.f32 %v288_v35, 0.0  ;;  %v1661_v37 = vpop.f32.mrb[4].mxu0  ;;  %2056 = vmatpush3.bf16.msra.mxu1 %v2053_v16  ;;  %v2077_v35 = vpack.c.bf16 %v1392_v34, %v1391_v33  ;;  %v1399_v33 = vld [vmem:[%s2553_s1 + $0x220] sm:$0xff]  ;;  %v1400_v34 = vld [vmem:[%s2553_s1 + $0x228] sm:$0xff] }
 0x104   : > { %v303_v39 = vadd.f32 %v1661_v37, %v210_v25  ;;  %v297_v40 = vpop.f32.mrb[5].mxu0  ;;  %2058 = vmatprep.subr.bf16.mxu1 %v2057_v18  ;;  %2086 = vmatprep.subr.bf16.mxu0 %v2085_v30 }
 0x105   : > { %v298_v41 = vadd.f32 %v297_v40, %v210_v25  ;;  %1712 = vmatprep.mubr.f32.mxu1 %v358_v36  ;;  %v391_v36 = vsub.s32 1, %v2357_v22 }
 0x106   : > { %1713 = vmatmul.mubr.f32.gmra.mrb[2].mxu1 %v359_v38  ;;  %v361_v44 = vmax.f32 %v303_v39, 0.0 }
 0x107   : > { %v360_v42 = vmax.f32 %v298_v41, 0.0  ;;  %v1664_v43 = vpop.f32.mrb[6].mxu0  ;;  %2060 = vmatpush3.bf16.msra.mxu1 %v2057_v18  ;;  %v392_v37 = vrot.slane %v2363_v24, %v391_v36  ;;  %v1401_v36 = vld [vmem:[%s2553_s1 + $0x230] sm:$0xff] }
 0x108   : > { %v313_v45 = vadd.f32 %v1664_v43, %v210_v25  ;;  %v307_v46 = vpop.f32.mrb[7].mxu0  ;;  %2062 = vmatprep.subr.bf16.mxu1 %v2061_v21 }
 0x109   : > { %v308_v47 = vadd.f32 %v307_v46, %v210_v25  ;;  %1715 = vmatprep.mubr.f32.mxu1 %v360_v42 }
 0x10a   : > { %1716 = vmatmul.mubr.f32.gmra.mrb[4].mxu1 %v361_v44  ;;  %v363_v50 = vmax.f32 %v313_v45, 0.0 }
 0x10b   : > { %v362_v48 = vmax.f32 %v308_v47, 0.0  ;;  %v1667_v49 = vpop.f32.mrb[8].mxu0  ;;  %2064 = vmatpush3.bf16.msra.mxu1 %v2061_v21 }
 0x10c   : > { %v323_v51 = vadd.f32 %v1667_v49, %v210_v25  ;;  %v317_v52 = vpop.f32.mrb[9].mxu0 }
 0x10d   : > { %v318_v53 = vadd.f32 %v317_v52, %v210_v25  ;;  %1718 = vmatprep.mubr.f32.mxu1 %v362_v48 }
 0x10e   : > { %1719 = vmatmul.mubr.f32.gmra.mrb[6].mxu1 %v363_v50  ;;  %v365_v56 = vmax.f32 %v323_v51, 0.0 }
 0x10f   : > { %v364_v54 = vmax.f32 %v318_v53, 0.0  ;;  %v1670_v55 = vpop.f32.mrb[10].mxu0 }
 0x110   : > { %v333_v57 = vadd.f32 %v1670_v55, %v210_v25  ;;  %v327_v58 = vpop.f32.mrb[11].mxu0 }
 0x111   : > { %v328_v59 = vadd.f32 %v327_v58, %v210_v25  ;;  %1721 = vmatprep.mubr.f32.mxu1 %v364_v54 }
 0x112   : > { %1722 = vmatmul.mubr.f32.gmra.mrb[8].mxu1 %v365_v56  ;;  %v367_v62 = vmax.f32 %v333_v57, 0.0 }
 0x113   : > { %v366_v60 = vmax.f32 %v328_v59, 0.0  ;;  %v1673_v61 = vpop.f32.mrb[12].mxu0 }
 0x114   : > { %v343_v63 = vadd.f32 %v1673_v61, %v210_v25  ;;  %v337_v0 = vpop.f32.mrb[13].mxu0 }
 0x115   : > { %v338_v1 = vadd.f32 %v337_v0, %v210_v25  ;;  %1724 = vmatprep.mubr.f32.mxu1 %v366_v60 }
 0x116   : > { %1725 = vmatmul.mubr.f32.gmra.mrb[10].mxu1 %v367_v62  ;;  %v369_v4 = vmax.f32 %v343_v63, 0.0 }
 0x117   : > { %v368_v2 = vmax.f32 %v338_v1, 0.0  ;;  %v1676_v3 = vpop.f32.mrb[14].mxu0 }
 0x118   : > { %v353_v5 = vadd.f32 %v1676_v3, %v210_v25  ;;  %v347_v6 = vpop.f32.mrb[15].mxu0 }
 0x119   : > { %v348_v7 = vadd.f32 %v347_v6, %v210_v25  ;;  %1727 = vmatprep.mubr.f32.mxu1 %v368_v2  ;;  %v1386_v25 = vld [vmem:[%s2553_s1 + $0x1b8] sm:$0xff] }
 0x11a   : > { %1728 = vmatmul.mubr.f32.gmra.mrb[12].mxu1 %v369_v4  ;;  %v371_v9 = vmax.f32 %v353_v5, 0.0  ;;  %v2065_v26 = vpack.c.bf16 %v1386_v25, %v1385_v23  ;;  %v1393_v23 = vld [vmem:[%s2553_s1 + $0x1f0] sm:$0xff]  ;;  %v1394_v25 = vld [vmem:[%s2553_s1 + $0x1f8] sm:$0xff] }
 0x11b   : > { %v370_v8 = vmax.f32 %v348_v7, 0.0 }
 0x11c   : > { %2066 = vmatprep.subr.bf16.mxu1 %v2065_v26 }
 0x11d   : > { %1730 = vmatprep.mubr.f32.mxu1 %v370_v8  ;;  %2068 = vmatpush3.bf16.msra.mxu1 %v2065_v26  ;;  %v2081_v26 = vpack.c.bf16 %v1394_v25, %v1393_v23 }
 0x11e   : > { %1731 = vmatmul.mubr.f32.gmra.mrb[14].mxu1 %v371_v9  ;;  %2070 = vmatprep.subr.bf16.mxu1 %v2069_v29 }
 0x121   : > { %2072 = vmatpush3.bf16.msra.mxu1 %v2069_v29  ;;  %v1397_v29 = vld [vmem:[%s2553_s1 + $0x210] sm:$0xff] }
 0x122   : > { %2074 = vmatprep.subr.bf16.mxu1 %v2073_v32 }
 0x125   : > { %2076 = vmatpush3.bf16.msra.mxu1 %v2073_v32  ;;  %v2089_v32 = vpack.c.bf16 %v1398_v31, %v1397_v29 }
 0x126   : > { %2078 = vmatprep.subr.bf16.mxu1 %v2077_v35 }
 0x129   : > { %2080 = vmatpush3.bf16.msra.mxu1 %v2077_v35  ;;  %v2093_v35 = vpack.c.bf16 %v1400_v34, %v1399_v33 }
 0x12a   : > { %2082 = vmatprep.subr.bf16.mxu1 %v2081_v26 }
 0x12d   : > { %2084 = vmatpush3.bf16.msra.mxu1 %v2081_v26 }
 0x1d5   : > { %v1711_v38 = vpop.f32.mrb[0].mxu1 }
 0x1d6   : > { %v465_v39 = vadd.f32 %v1711_v38, %v392_v37  ;;  %v459_v40 = vpop.f32.mrb[1].mxu1 }
 0x1d7   : > { %v460_v41 = vadd.f32 %v459_v40, %v392_v37  ;;  %v1404_v40 = vld [vmem:[%s2553_s1 + $0x248] sm:$0xff] }
 0x1d8   : > { %v539_v44 = vmax.f32 %v465_v39, 0.0  ;;  %v1403_v39 = vld [vmem:[%s2553_s1 + $0x240] sm:$0xff] }
 0x1d9   : > { %v538_v42 = vmax.f32 %v460_v41, 0.0  ;;  %v1714_v43 = vpop.f32.mrb[2].mxu1  ;;  %v2101_v41 = vpack.c.bf16 %v1404_v40, %v1403_v39  ;;  %v1411_v39 = vld [vmem:[%s2553_s1 + $0x280] sm:$0xff]  ;;  %v1412_v40 = vld [vmem:[%s2553_s1 + $0x288] sm:$0xff] }
 0x1da   : > { %v475_v45 = vadd.f32 %v1714_v43, %v392_v37  ;;  %v469_v46 = vpop.f32.mrb[3].mxu1  ;;  %v1406_v43 = vld [vmem:[%s2553_s1 + $0x258] sm:$0xff] }
 0x1db   : > { %v470_v47 = vadd.f32 %v469_v46, %v392_v37  ;;  %1765 = vmatprep.mubr.f32.mxu0 %v538_v42  ;;  %v1405_v42 = vld [vmem:[%s2553_s1 + $0x250] sm:$0xff]  ;;  %v1408_v46 = vld [vmem:[%s2553_s1 + $0x268] sm:$0xff] }
 0x1dc   : > { %1766 = vmatmul.mubr.f32.vlgmr.msra.gmra.mrb[16].mxu0 %v539_v44  ;;  %v541_v50 = vmax.f32 %v475_v45, 0.0  ;;  %v2105_v44 = vpack.c.bf16 %v1406_v43, %v1405_v42  ;;  %v1407_v45 = vld [vmem:[%s2553_s1 + $0x260] sm:$0xff]  ;;  %v2117_v42 = vpack.c.bf16 %v1412_v40, %v1411_v39  ;;  %v1414_v43 = vld [vmem:[%s2553_s1 + $0x298] sm:$0xff] }
 0x1dd   : > { %v540_v48 = vmax.f32 %v470_v47, 0.0  ;;  %v1717_v49 = vpop.f32.mrb[4].mxu1  ;;  %2088 = vmatpush3.bf16.msra.mxu0 %v2085_v30  ;;  %v2109_v47 = vpack.c.bf16 %v1408_v46, %v1407_v45  ;;  %v1415_v45 = vld [vmem:[%s2553_s1 + $0x2a0] sm:$0xff]  ;;  %v1416_v46 = vld [vmem:[%s2553_s1 + $0x2a8] sm:$0xff] }
 0x1de   : > { %v485_v51 = vadd.f32 %v1717_v49, %v392_v37  ;;  %v479_v52 = vpop.f32.mrb[5].mxu1  ;;  %2090 = vmatprep.subr.bf16.mxu0 %v2089_v32  ;;  %2118 = vmatprep.subr.bf16.mxu1 %v2117_v42 }
 0x1df   : > { %v480_v53 = vadd.f32 %v479_v52, %v392_v37  ;;  %1768 = vmatprep.mubr.f32.mxu0 %v540_v48  ;;  %v573_v48 = vsub.s32 2, %v2357_v22 }
 0x1e0   : > { %1769 = vmatmul.mubr.f32.gmra.mrb[18].mxu0 %v541_v50  ;;  %v543_v56 = vmax.f32 %v485_v51, 0.0 }
 0x1e1   : > { %v542_v54 = vmax.f32 %v480_v53, 0.0  ;;  %v1720_v55 = vpop.f32.mrb[6].mxu1  ;;  %2092 = vmatpush3.bf16.msra.mxu0 %v2089_v32  ;;  %v574_v49 = vrot.slane %v2363_v24, %v573_v48  ;;  %v1417_v48 = vld [vmem:[%s2553_s1 + $0x2b0] sm:$0xff] }
 0x1e2   : > { %v495_v57 = vadd.f32 %v1720_v55, %v392_v37  ;;  %v489_v58 = vpop.f32.mrb[7].mxu1  ;;  %2094 = vmatprep.subr.bf16.mxu0 %v2093_v35 }
 0x1e3   : > { %v490_v59 = vadd.f32 %v489_v58, %v392_v37  ;;  %1771 = vmatprep.mubr.f32.mxu0 %v542_v54 }
 0x1e4   : > { %1772 = vmatmul.mubr.f32.gmra.mrb[20].mxu0 %v543_v56  ;;  %v545_v62 = vmax.f32 %v495_v57, 0.0 }
 0x1e5   : > { %v544_v60 = vmax.f32 %v490_v59, 0.0  ;;  %v1723_v61 = vpop.f32.mrb[8].mxu1  ;;  %2096 = vmatpush3.bf16.msra.mxu0 %v2093_v35 }
 0x1e6   : > { %v505_v63 = vadd.f32 %v1723_v61, %v392_v37  ;;  %v499_v0 = vpop.f32.mrb[9].mxu1 }
 0x1e7   : > { %v500_v1 = vadd.f32 %v499_v0, %v392_v37  ;;  %1774 = vmatprep.mubr.f32.mxu0 %v544_v60 }
 0x1e8   : > { %1775 = vmatmul.mubr.f32.gmra.mrb[22].mxu0 %v545_v62  ;;  %v547_v4 = vmax.f32 %v505_v63, 0.0 }
 0x1e9   : > { %v546_v2 = vmax.f32 %v500_v1, 0.0  ;;  %v1726_v3 = vpop.f32.mrb[10].mxu1 }
 0x1ea   : > { %v515_v5 = vadd.f32 %v1726_v3, %v392_v37  ;;  %v509_v6 = vpop.f32.mrb[11].mxu1 }
 0x1eb   : > { %v510_v7 = vadd.f32 %v509_v6, %v392_v37  ;;  %1777 = vmatprep.mubr.f32.mxu0 %v546_v2 }
 0x1ec   : > { %1778 = vmatmul.mubr.f32.gmra.mrb[24].mxu0 %v547_v4  ;;  %v549_v10 = vmax.f32 %v515_v5, 0.0 }
 0x1ed   : > { %v548_v8 = vmax.f32 %v510_v7, 0.0  ;;  %v1729_v9 = vpop.f32.mrb[12].mxu1 }
 0x1ee   : > { %v525_v11 = vadd.f32 %v1729_v9, %v392_v37  ;;  %v519_v12 = vpop.f32.mrb[13].mxu1 }
 0x1ef   : > { %v520_v13 = vadd.f32 %v519_v12, %v392_v37  ;;  %1780 = vmatprep.mubr.f32.mxu0 %v548_v8 }
 0x1f0   : > { %1781 = vmatmul.mubr.f32.gmra.mrb[26].mxu0 %v549_v10  ;;  %v551_v16 = vmax.f32 %v525_v11, 0.0 }
 0x1f1   : > { %v550_v14 = vmax.f32 %v520_v13, 0.0  ;;  %v1732_v15 = vpop.f32.mrb[14].mxu1 }
 0x1f2   : > { %v535_v17 = vadd.f32 %v1732_v15, %v392_v37  ;;  %v529_v18 = vpop.f32.mrb[15].mxu1 }
 0x1f3   : > { %v530_v19 = vadd.f32 %v529_v18, %v392_v37  ;;  %1783 = vmatprep.mubr.f32.mxu0 %v550_v14  ;;  %v1402_v37 = vld [vmem:[%s2553_s1 + $0x238] sm:$0xff] }
 0x1f4   : > { %1784 = vmatmul.mubr.f32.gmra.mrb[28].mxu0 %v551_v16  ;;  %v553_v21 = vmax.f32 %v535_v17, 0.0  ;;  %v2097_v38 = vpack.c.bf16 %v1402_v37, %v1401_v36  ;;  %v1409_v36 = vld [vmem:[%s2553_s1 + $0x270] sm:$0xff]  ;;  %v1410_v37 = vld [vmem:[%s2553_s1 + $0x278] sm:$0xff] }
 0x1f5   : > { %v552_v20 = vmax.f32 %v530_v19, 0.0 }
 0x1f6   : > { %2098 = vmatprep.subr.bf16.mxu0 %v2097_v38 }
 0x1f7   : > { %1786 = vmatprep.mubr.f32.mxu0 %v552_v20  ;;  %2100 = vmatpush3.bf16.msra.mxu0 %v2097_v38  ;;  %v2113_v38 = vpack.c.bf16 %v1410_v37, %v1409_v36 }
 0x1f8   : > { %1787 = vmatmul.mubr.f32.gmra.mrb[30].mxu0 %v553_v21  ;;  %2102 = vmatprep.subr.bf16.mxu0 %v2101_v41 }
 0x1fb   : > { %2104 = vmatpush3.bf16.msra.mxu0 %v2101_v41  ;;  %v1413_v41 = vld [vmem:[%s2553_s1 + $0x290] sm:$0xff] }
 0x1fc   : > { %2106 = vmatprep.subr.bf16.mxu0 %v2105_v44 }
 0x1ff   : > { %2108 = vmatpush3.bf16.msra.mxu0 %v2105_v44  ;;  %v2121_v44 = vpack.c.bf16 %v1414_v43, %v1413_v41 }
 0x200   : > { %2110 = vmatprep.subr.bf16.mxu0 %v2109_v47 }
 0x203   : > { %2112 = vmatpush3.bf16.msra.mxu0 %v2109_v47  ;;  %v2125_v47 = vpack.c.bf16 %v1416_v46, %v1415_v45 }
 0x204   : > { %2114 = vmatprep.subr.bf16.mxu0 %v2113_v38 }
 0x207   : > { %2116 = vmatpush3.bf16.msra.mxu0 %v2113_v38 }
 0x2af   : > { %v1767_v50 = vpop.f32.mrb[16].mxu0 }
 0x2b0   : > { %v647_v51 = vadd.f32 %v1767_v50, %v574_v49  ;;  %v641_v52 = vpop.f32.mrb[17].mxu0 }
 0x2b1   : > { %v642_v53 = vadd.f32 %v641_v52, %v574_v49  ;;  %v1420_v52 = vld [vmem:[%s2553_s1 + $0x2c8] sm:$0xff] }
 0x2b2   : > { %v721_v56 = vmax.f32 %v647_v51, 0.0  ;;  %v1419_v51 = vld [vmem:[%s2553_s1 + $0x2c0] sm:$0xff] }
 0x2b3   : > { %v720_v54 = vmax.f32 %v642_v53, 0.0  ;;  %v1770_v55 = vpop.f32.mrb[18].mxu0  ;;  %v2133_v53 = vpack.c.bf16 %v1420_v52, %v1419_v51  ;;  %v937_v51 = vsub.s32 4, %v2357_v22 }
 0x2b4   : > { %v657_v57 = vadd.f32 %v1770_v55, %v574_v49  ;;  %v651_v58 = vpop.f32.mrb[19].mxu0  ;;  %v1422_v55 = vld [vmem:[%s2553_s1 + $0x2d8] sm:$0xff] }
 0x2b5   : > { %v652_v59 = vadd.f32 %v651_v58, %v574_v49  ;;  %1821 = vmatprep.mubr.f32.mxu1 %v720_v54  ;;  %v1421_v54 = vld [vmem:[%s2553_s1 + $0x2d0] sm:$0xff]  ;;  %v1424_v58 = vld [vmem:[%s2553_s1 + $0x2e8] sm:$0xff]  ;;  %v938_v52 = vrot.slane %v2363_v24, %v937_v51 }
 0x2b6   : > { %1822 = vmatmul.mubr.f32.vlgmr.msra.gmra.mrb[16].mxu1 %v721_v56  ;;  %v723_v62 = vmax.f32 %v657_v57, 0.0  ;;  %v2137_v56 = vpack.c.bf16 %v1422_v55, %v1421_v54  ;;  %v1423_v57 = vld [vmem:[%s2553_s1 + $0x2e0] sm:$0xff] }
 0x2b7   : > { %v722_v60 = vmax.f32 %v652_v59, 0.0  ;;  %v1773_v61 = vpop.f32.mrb[20].mxu0  ;;  %2120 = vmatpush3.bf16.msra.mxu1 %v2117_v42  ;;  %v2141_v59 = vpack.c.bf16 %v1424_v58, %v1423_v57 }
 0x2b8   : > { %v667_v63 = vadd.f32 %v1773_v61, %v574_v49  ;;  %v661_v0 = vpop.f32.mrb[21].mxu0  ;;  %2122 = vmatprep.subr.bf16.mxu1 %v2121_v44 }
 0x2b9   : > { %v662_v1 = vadd.f32 %v661_v0, %v574_v49  ;;  %1824 = vmatprep.mubr.f32.mxu1 %v722_v60  ;;  %v755_v60 = vsub.s32 3, %v2357_v22 }
 0x2ba   : > { %1825 = vmatmul.mubr.f32.gmra.mrb[18].mxu1 %v723_v62  ;;  %v725_v4 = vmax.f32 %v667_v63, 0.0 }
 0x2bb   : > { %v724_v2 = vmax.f32 %v662_v1, 0.0  ;;  %v1776_v3 = vpop.f32.mrb[22].mxu0  ;;  %2124 = vmatpush3.bf16.msra.mxu1 %v2121_v44  ;;  %v756_v61 = vrot.slane %v2363_v24, %v755_v60 }
 0x2bc   : > { %v677_v5 = vadd.f32 %v1776_v3, %v574_v49  ;;  %v671_v6 = vpop.f32.mrb[23].mxu0  ;;  %2126 = vmatprep.subr.bf16.mxu1 %v2125_v47 }
 0x2bd   : > { %v672_v7 = vadd.f32 %v671_v6, %v574_v49  ;;  %1827 = vmatprep.mubr.f32.mxu1 %v724_v2 }
 0x2be   : > { %1828 = vmatmul.mubr.f32.gmra.mrb[20].mxu1 %v725_v4  ;;  %v727_v10 = vmax.f32 %v677_v5, 0.0 }
 0x2bf   : > { %v726_v8 = vmax.f32 %v672_v7, 0.0  ;;  %v1779_v9 = vpop.f32.mrb[24].mxu0  ;;  %2128 = vmatpush3.bf16.msra.mxu1 %v2125_v47 }
 0x2c0   : > { %v687_v11 = vadd.f32 %v1779_v9, %v574_v49  ;;  %v681_v12 = vpop.f32.mrb[25].mxu0 }
 0x2c1   : > { %v682_v13 = vadd.f32 %v681_v12, %v574_v49  ;;  %1830 = vmatprep.mubr.f32.mxu1 %v726_v8 }
 0x2c2   : > { %1831 = vmatmul.mubr.f32.gmra.mrb[22].mxu1 %v727_v10  ;;  %v729_v16 = vmax.f32 %v687_v11, 0.0 }
 0x2c3   : > { %v728_v14 = vmax.f32 %v682_v13, 0.0  ;;  %v1782_v15 = vpop.f32.mrb[26].mxu0 }
 0x2c4   : > { %v697_v17 = vadd.f32 %v1782_v15, %v574_v49  ;;  %v691_v18 = vpop.f32.mrb[27].mxu0 }
 0x2c5   : > { %v692_v19 = vadd.f32 %v691_v18, %v574_v49  ;;  %1833 = vmatprep.mubr.f32.mxu1 %v728_v14 }
 0x2c6   : > { %1834 = vmatmul.mubr.f32.gmra.mrb[24].mxu1 %v729_v16  ;;  %v731_v23 = vmax.f32 %v697_v17, 0.0 }
 0x2c7   : > { %v730_v20 = vmax.f32 %v692_v19, 0.0  ;;  %v1785_v21 = vpop.f32.mrb[28].mxu0 }
 0x2c8   : > { %v707_v25 = vadd.f32 %v1785_v21, %v574_v49  ;;  %v701_v26 = vpop.f32.mrb[29].mxu0 }
 0x2c9   : > { %v702_v27 = vadd.f32 %v701_v26, %v574_v49  ;;  %1836 = vmatprep.mubr.f32.mxu1 %v730_v20 }
 0x2ca   : > { %1837 = vmatmul.mubr.f32.gmra.mrb[26].mxu1 %v731_v23  ;;  %v733_v30 = vmax.f32 %v707_v25, 0.0 }
 0x2cb   : > { %v732_v28 = vmax.f32 %v702_v27, 0.0  ;;  %v1788_v29 = vpop.f32.mrb[30].mxu0 }
 0x2cc   : > { %v717_v31 = vadd.f32 %v1788_v29, %v574_v49  ;;  %v711_v32 = vpop.f32.mrb[31].mxu0 }
 0x2cd   : > { %v712_v33 = vadd.f32 %v711_v32, %v574_v49  ;;  %1839 = vmatprep.mubr.f32.mxu1 %v732_v28  ;;  %v1418_v49 = vld [vmem:[%s2553_s1 + $0x2b8] sm:$0xff] }
 0x2ce   : > { %1840 = vmatmul.mubr.f32.gmra.mrb[28].mxu1 %v733_v30  ;;  %v735_v35 = vmax.f32 %v717_v31, 0.0  ;;  %v2129_v50 = vpack.c.bf16 %v1418_v49, %v1417_v48  ;;  %v1425_v48 = vld [vmem:[%s2553_s1 + $0x2f0] sm:$0xff]  ;;  %v1426_v49 = vld [vmem:[%s2553_s1 + $0x2f8] sm:$0xff] }
 0x2cf   : > { %v734_v34 = vmax.f32 %v712_v33, 0.0 }
 0x2d0   : > { %2130 = vmatprep.subr.bf16.mxu1 %v2129_v50 }
 0x2d1   : > { %1842 = vmatprep.mubr.f32.mxu1 %v734_v34  ;;  %2132 = vmatpush3.bf16.msra.mxu1 %v2129_v50  ;;  %v2145_v50 = vpack.c.bf16 %v1426_v49, %v1425_v48 }
 0x2d2   : > { %1843 = vmatmul.mubr.f32.gmra.mrb[30].mxu1 %v735_v35  ;;  %2134 = vmatprep.subr.bf16.mxu1 %v2133_v53 }
 0x2d5   : > { %2136 = vmatpush3.bf16.msra.mxu1 %v2133_v53 }
 0x2d6   : > { %2138 = vmatprep.subr.bf16.mxu1 %v2137_v56 }
 0x2d9   : > { %2140 = vmatpush3.bf16.msra.mxu1 %v2137_v56 }
 0x2da   : > { %2142 = vmatprep.subr.bf16.mxu1 %v2141_v59 }
 0x2dd   : > { %2144 = vmatpush3.bf16.msra.mxu1 %v2141_v59 }
 0x2de   : > { %2146 = vmatprep.subr.bf16.mxu1 %v2145_v50 }
 0x2e1   : > { %2148 = vmatpush3.bf16.msra.mxu1 %v2145_v50 }
 0x389   : > { %v1823_v62 = vpop.f32.mrb[16].mxu1 }
 0x38a   : > { %v829_v63 = vadd.f32 %v1823_v62, %v756_v61  ;;  %v823_v0 = vpop.f32.mrb[17].mxu1 }
 0x38b   : > { %v824_v1 = vadd.f32 %v823_v0, %v756_v61 }
 0x38c   : > { %v903_v4 = vmax.f32 %v829_v63, 0.0 }
 0x38d   : > { %v902_v2 = vmax.f32 %v824_v1, 0.0  ;;  %v1826_v3 = vpop.f32.mrb[18].mxu1 }
 0x38e   : > { %v839_v5 = vadd.f32 %v1826_v3, %v756_v61  ;;  %v833_v6 = vpop.f32.mrb[19].mxu1 }
 0x38f   : > { %v834_v7 = vadd.f32 %v833_v6, %v756_v61  ;;  %1877 = vmatprep.mubr.f32.mxu0 %v902_v2 }
 0x390   : > { %1878 = vmatmul.mubr.f32.vlgmr.msra.gmra.mrb[32].mxu0 %v903_v4  ;;  %v905_v10 = vmax.f32 %v839_v5, 0.0 }
 0x391   : > { %v904_v8 = vmax.f32 %v834_v7, 0.0  ;;  %v1829_v9 = vpop.f32.mrb[20].mxu1 }
 0x392   : > { %v849_v11 = vadd.f32 %v1829_v9, %v756_v61  ;;  %v843_v12 = vpop.f32.mrb[21].mxu1 }
 0x393   : > { %v844_v13 = vadd.f32 %v843_v12, %v756_v61  ;;  %1880 = vmatprep.mubr.f32.mxu0 %v904_v8 }
 0x394   : > { %1881 = vmatmul.mubr.f32.gmra.mrb[34].mxu0 %v905_v10  ;;  %v907_v16 = vmax.f32 %v849_v11, 0.0 }
 0x395   : > { %v906_v14 = vmax.f32 %v844_v13, 0.0  ;;  %v1832_v15 = vpop.f32.mrb[22].mxu1 }
 0x396   : > { %v859_v17 = vadd.f32 %v1832_v15, %v756_v61  ;;  %v853_v18 = vpop.f32.mrb[23].mxu1 }
 0x397   : > { %v854_v19 = vadd.f32 %v853_v18, %v756_v61  ;;  %1883 = vmatprep.mubr.f32.mxu0 %v906_v14 }
 0x398   : > { %1884 = vmatmul.mubr.f32.gmra.mrb[36].mxu0 %v907_v16  ;;  %v909_v23 = vmax.f32 %v859_v17, 0.0 }
 0x399   : > { %v908_v20 = vmax.f32 %v854_v19, 0.0  ;;  %v1835_v21 = vpop.f32.mrb[24].mxu1 }
 0x39a   : > { %v869_v25 = vadd.f32 %v1835_v21, %v756_v61  ;;  %v863_v26 = vpop.f32.mrb[25].mxu1 }
 0x39b   : > { %v864_v27 = vadd.f32 %v863_v26, %v756_v61  ;;  %1886 = vmatprep.mubr.f32.mxu0 %v908_v20 }
 0x39c   : > { %1887 = vmatmul.mubr.f32.gmra.mrb[38].mxu0 %v909_v23  ;;  %v911_v30 = vmax.f32 %v869_v25, 0.0 }
 0x39d   : > { %v910_v28 = vmax.f32 %v864_v27, 0.0  ;;  %v1838_v29 = vpop.f32.mrb[26].mxu1 }
 0x39e   : > { %v879_v31 = vadd.f32 %v1838_v29, %v756_v61  ;;  %v873_v32 = vpop.f32.mrb[27].mxu1 }
 0x39f   : > { %v874_v33 = vadd.f32 %v873_v32, %v756_v61  ;;  %1889 = vmatprep.mubr.f32.mxu0 %v910_v28 }
 0x3a0   : > { %1890 = vmatmul.mubr.f32.gmra.mrb[40].mxu0 %v911_v30  ;;  %v913_v36 = vmax.f32 %v879_v31, 0.0 }
 0x3a1   : > { %v912_v34 = vmax.f32 %v874_v33, 0.0  ;;  %v1841_v35 = vpop.f32.mrb[28].mxu1 }
 0x3a2   : > { %v889_v37 = vadd.f32 %v1841_v35, %v756_v61  ;;  %v883_v38 = vpop.f32.mrb[29].mxu1 }
 0x3a3   : > { %v884_v39 = vadd.f32 %v883_v38, %v756_v61  ;;  %1892 = vmatprep.mubr.f32.mxu0 %v912_v34 }
 0x3a4   : > { %1893 = vmatmul.mubr.f32.gmra.mrb[42].mxu0 %v913_v36  ;;  %v915_v42 = vmax.f32 %v889_v37, 0.0 }
 0x3a5   : > { %v914_v40 = vmax.f32 %v884_v39, 0.0  ;;  %v1844_v41 = vpop.f32.mrb[30].mxu1  ;;  %v1119_v39 = vsub.s32 5, %v2357_v22 }
 0x3a6   : > { %v899_v43 = vadd.f32 %v1844_v41, %v756_v61  ;;  %v893_v44 = vpop.f32.mrb[31].mxu1 }
 0x3a7   : > { %v894_v45 = vadd.f32 %v893_v44, %v756_v61  ;;  %1895 = vmatprep.mubr.f32.mxu0 %v914_v40  ;;  %v1120_v40 = vrot.slane %v2363_v24, %v1119_v39 }
 0x3a8   : > { %1896 = vmatmul.mubr.f32.gmra.mrb[44].mxu0 %v915_v42  ;;  %v917_v47 = vmax.f32 %v899_v43, 0.0 }
 0x3a9   : > { %v916_v46 = vmax.f32 %v894_v45, 0.0 }
 0x3ab   : > { %1898 = vmatprep.mubr.f32.mxu0 %v916_v46 }
 0x3ac   : > { %1899 = vmatmul.mubr.f32.gmra.mrb[46].mxu0 %v917_v47 }
 0x463   : > { %v1879_v53 = vpop.f32.mrb[32].mxu0 }
 0x464   : > { %v1011_v54 = vadd.f32 %v1879_v53, %v938_v52  ;;  %v1005_v55 = vpop.f32.mrb[33].mxu0 }
 0x465   : > { %v1006_v56 = vadd.f32 %v1005_v55, %v938_v52 }
 0x466   : > { %v1085_v59 = vmax.f32 %v1011_v54, 0.0 }
 0x467   : > { %v1084_v57 = vmax.f32 %v1006_v56, 0.0  ;;  %v1882_v58 = vpop.f32.mrb[34].mxu0 }
 0x468   : > { %v1021_v60 = vadd.f32 %v1882_v58, %v938_v52  ;;  %v1015_v61 = vpop.f32.mrb[35].mxu0 }
 0x469   : > { %v1016_v62 = vadd.f32 %v1015_v61, %v938_v52  ;;  %1933 = vmatprep.mubr.f32.mxu1 %v1084_v57 }
 0x46a   : > { %1934 = vmatmul.mubr.f32.vlgmr.msra.gmra.mrb[32].mxu1 %v1085_v59  ;;  %v1087_v1 = vmax.f32 %v1021_v60, 0.0 }
 0x46b   : > { %v1086_v63 = vmax.f32 %v1016_v62, 0.0  ;;  %v1885_v0 = vpop.f32.mrb[36].mxu0 }
 0x46c   : > { %v1031_v2 = vadd.f32 %v1885_v0, %v938_v52  ;;  %v1025_v3 = vpop.f32.mrb[37].mxu0 }
 0x46d   : > { %v1026_v4 = vadd.f32 %v1025_v3, %v938_v52  ;;  %1936 = vmatprep.mubr.f32.mxu1 %v1086_v63 }
 0x46e   : > { %1937 = vmatmul.mubr.f32.gmra.mrb[34].mxu1 %v1087_v1  ;;  %v1089_v7 = vmax.f32 %v1031_v2, 0.0 }
 0x46f   : > { %v1088_v5 = vmax.f32 %v1026_v4, 0.0  ;;  %v1888_v6 = vpop.f32.mrb[38].mxu0 }
 0x470   : > { %v1041_v8 = vadd.f32 %v1888_v6, %v938_v52  ;;  %v1035_v9 = vpop.f32.mrb[39].mxu0 }
 0x471   : > { %v1036_v10 = vadd.f32 %v1035_v9, %v938_v52  ;;  %1939 = vmatprep.mubr.f32.mxu1 %v1088_v5 }
 0x472   : > { %1940 = vmatmul.mubr.f32.gmra.mrb[36].mxu1 %v1089_v7  ;;  %v1091_v13 = vmax.f32 %v1041_v8, 0.0 }
 0x473   : > { %v1090_v11 = vmax.f32 %v1036_v10, 0.0  ;;  %v1891_v12 = vpop.f32.mrb[40].mxu0 }
 0x474   : > { %v1051_v14 = vadd.f32 %v1891_v12, %v938_v52  ;;  %v1045_v15 = vpop.f32.mrb[41].mxu0 }
 0x475   : > { %v1046_v16 = vadd.f32 %v1045_v15, %v938_v52  ;;  %1942 = vmatprep.mubr.f32.mxu1 %v1090_v11 }
 0x476   : > { %1943 = vmatmul.mubr.f32.gmra.mrb[38].mxu1 %v1091_v13  ;;  %v1093_v19 = vmax.f32 %v1051_v14, 0.0 }
 0x477   : > { %v1092_v17 = vmax.f32 %v1046_v16, 0.0  ;;  %v1894_v18 = vpop.f32.mrb[42].mxu0 }
 0x478   : > { %v1061_v20 = vadd.f32 %v1894_v18, %v938_v52  ;;  %v1055_v21 = vpop.f32.mrb[43].mxu0 }
 0x479   : > { %v1056_v23 = vadd.f32 %v1055_v21, %v938_v52  ;;  %1945 = vmatprep.mubr.f32.mxu1 %v1092_v17 }
 0x47a   : > { %1946 = vmatmul.mubr.f32.gmra.mrb[40].mxu1 %v1093_v19  ;;  %v1095_v27 = vmax.f32 %v1061_v20, 0.0 }
 0x47b   : > { %v1094_v25 = vmax.f32 %v1056_v23, 0.0  ;;  %v1897_v26 = vpop.f32.mrb[44].mxu0 }
 0x47c   : > { %v1071_v28 = vadd.f32 %v1897_v26, %v938_v52  ;;  %v1065_v29 = vpop.f32.mrb[45].mxu0 }
 0x47d   : > { %v1066_v30 = vadd.f32 %v1065_v29, %v938_v52  ;;  %1948 = vmatprep.mubr.f32.mxu1 %v1094_v25 }
 0x47e   : > { %1949 = vmatmul.mubr.f32.gmra.mrb[42].mxu1 %v1095_v27  ;;  %v1097_v33 = vmax.f32 %v1071_v28, 0.0 }
 0x47f   : > { %v1096_v31 = vmax.f32 %v1066_v30, 0.0  ;;  %v1900_v32 = vpop.f32.mrb[46].mxu0 }
 0x480   : > { %v1081_v34 = vadd.f32 %v1900_v32, %v938_v52  ;;  %v1075_v35 = vpop.f32.mrb[47].mxu0 }
 0x481   : > { %v1076_v36 = vadd.f32 %v1075_v35, %v938_v52  ;;  %1951 = vmatprep.mubr.f32.mxu1 %v1096_v31 }
 0x482   : > { %1952 = vmatmul.mubr.f32.gmra.mrb[44].mxu1 %v1097_v33  ;;  %v1099_v38 = vmax.f32 %v1081_v34, 0.0 }
 0x483   : > { %v1098_v37 = vmax.f32 %v1076_v36, 0.0 }
 0x485   : > { %1954 = vmatprep.mubr.f32.mxu1 %v1098_v37 }
 0x486   : > { %1955 = vmatmul.mubr.f32.gmra.mrb[46].mxu1 %v1099_v38 }
 0x53d   : > { %v1935_v41 = vpop.f32.mrb[32].mxu1 }
 0x53e   : > { %v1193_v42 = vadd.f32 %v1935_v41, %v1120_v40  ;;  %v1187_v43 = vpop.f32.mrb[33].mxu1 }
 0x53f   : > { %v1188_v44 = vadd.f32 %v1187_v43, %v1120_v40 }
 0x540   : > { %1267 = vst [vmem:[%s2531_s23 + $0x8] sm:$0xff] %v1193_v42 }
 0x541   : > { %1266 = vst [vmem:[%s2531_s23] sm:$0xff] %v1188_v44  ;;  %v1938_v22 = vpop.f32.mrb[34].mxu1 }
 0x542   : > { %v1203_v24 = vadd.f32 %v1938_v22, %v1120_v40  ;;  %v1197_v45 = vpop.f32.mrb[35].mxu1 }
 0x543   : > { %v1198_v46 = vadd.f32 %v1197_v45, %v1120_v40 }
 0x544   : > { %1269 = vst [vmem:[%s2531_s23 + $0x18] sm:$0xff] %v1203_v24 }
 0x545   : > { %1268 = vst [vmem:[%s2531_s23 + $0x10] sm:$0xff] %v1198_v46  ;;  %v1941_v47 = vpop.f32.mrb[36].mxu1 }
 0x546   : > { %v1213_v48 = vadd.f32 %v1941_v47, %v1120_v40  ;;  %v1207_v49 = vpop.f32.mrb[37].mxu1 }
 0x547   : > { %v1208_v50 = vadd.f32 %v1207_v49, %v1120_v40 }
 0x548   : > { %1271 = vst [vmem:[%s2531_s23 + $0x28] sm:$0xff] %v1213_v48 }
 0x549   : > { %1270 = vst [vmem:[%s2531_s23 + $0x20] sm:$0xff] %v1208_v50  ;;  %v1944_v51 = vpop.f32.mrb[38].mxu1 }
 0x54a   : > { %v1223_v52 = vadd.f32 %v1944_v51, %v1120_v40  ;;  %v1217_v53 = vpop.f32.mrb[39].mxu1 }
 0x54b   : > { %v1218_v54 = vadd.f32 %v1217_v53, %v1120_v40 }
 0x54c   : > { %1273 = vst [vmem:[%s2531_s23 + $0x38] sm:$0xff] %v1223_v52 }
 0x54d   : > { %1272 = vst [vmem:[%s2531_s23 + $0x30] sm:$0xff] %v1218_v54  ;;  %v1947_v55 = vpop.f32.mrb[40].mxu1 }
 0x54e   : > { %v1233_v56 = vadd.f32 %v1947_v55, %v1120_v40  ;;  %v1227_v57 = vpop.f32.mrb[41].mxu1 }
 0x54f   : > { %v1228_v58 = vadd.f32 %v1227_v57, %v1120_v40 }
 0x550   : > { %1275 = vst [vmem:[%s2531_s23 + $0x48] sm:$0xff] %v1233_v56 }
 0x551   : > { %1274 = vst [vmem:[%s2531_s23 + $0x40] sm:$0xff] %v1228_v58  ;;  %v1950_v59 = vpop.f32.mrb[42].mxu1 }
 0x552   : > { %v1243_v60 = vadd.f32 %v1950_v59, %v1120_v40  ;;  %v1237_v61 = vpop.f32.mrb[43].mxu1 }
 0x553   : > { %v1238_v62 = vadd.f32 %v1237_v61, %v1120_v40 }
 0x554   : > { %1277 = vst [vmem:[%s2531_s23 + $0x58] sm:$0xff] %v1243_v60 }
 0x555   : > { %1276 = vst [vmem:[%s2531_s23 + $0x50] sm:$0xff] %v1238_v62  ;;  %v1953_v63 = vpop.f32.mrb[44].mxu1 }
 0x556   : > { %v1253_v0 = vadd.f32 %v1953_v63, %v1120_v40  ;;  %v1247_v1 = vpop.f32.mrb[45].mxu1 }
 0x557   : > { %v1248_v2 = vadd.f32 %v1247_v1, %v1120_v40 }
 0x558   : > { %1279 = vst [vmem:[%s2531_s23 + $0x68] sm:$0xff] %v1253_v0 }
 0x559   : > { %1278 = vst [vmem:[%s2531_s23 + $0x60] sm:$0xff] %v1248_v2  ;;  %v1956_v3 = vpop.f32.mrb[46].mxu1 }
 0x55a   : > { %v1263_v4 = vadd.f32 %v1956_v3, %v1120_v40  ;;  %v1257_v5 = vpop.f32.mrb[47].mxu1 }
 0x55b   : > { %v1258_v6 = vadd.f32 %v1257_v5, %v1120_v40 }
 0x55c   : > { %1281 = vst [vmem:[%s2531_s23 + $0x78] sm:$0xff] %v1263_v4 }
 0x55d   : > { %1280 = vst [vmem:[%s2531_s23 + $0x70] sm:$0xff] %v1258_v6 }
 0x55e PF: > { %s13_s12 = sadd.s32 1, %s2163_s12  }
 0x55f   : > { %p10_p4 = scmp.ge.s32.totalorder %s13_s12, 4  }
 0x561   :  { %12 = sbr.rel (!%p10_p4) target bundleno = 1 (0x1), region = 67 }

</bundles_post_ra>
